<compile_context>
chip_gen: v7x
topology: tpu7x:2x2x1
jax: 0.10.0
libtpu: 0.0.40
codegen_flags: <defaults>
</compile_context>

<pallas_src>
import functools
import math

import jax
import jax.numpy as jnp
from jax.experimental import pallas as pl
from jax.experimental.pallas import tpu as pltpu


# ---------------------------------------------------------------------------
# Kernel
# ---------------------------------------------------------------------------
def _mapper_kernel(*refs, split_residual):
    """One (TILE_M, TILE_N) output tile of  y = ReLU(x @ W.T + b) + x.

    refs (split_residual=False): x(tm,E), wt(E,tn==E), b(1,tn), o(tm,tn)
    refs (split_residual=True) : x(tm,E), x_res(tm,tn), wt(E,tn), b(1,tn), o(tm,tn)
    """
    if split_residual:
        x_ref, xres_ref, wt_ref, b_ref, o_ref = refs
    else:
        x_ref, wt_ref, b_ref, o_ref = refs
        xres_ref = None

    x = x_ref[...]                                                      # (tm, E)
    y = jnp.dot(x, wt_ref[...], preferred_element_type=jnp.float32)    # MXU, f32 acc
    y = jnp.maximum(y + b_ref[...].astype(jnp.float32), 0.0)           # bias + ReLU
    res = x if xres_ref is None else xres_ref[...]
    # TODO(synk): Dropout with p > 0.0 (training mode) not implemented; p=0.0 is identity.
    o_ref[...] = (y + res.astype(jnp.float32)).astype(o_ref.dtype)     # residual add


# ---------------------------------------------------------------------------
# Tile / VMEM budgeting helpers (all trace-time Python ints)
# ---------------------------------------------------------------------------
def _round_up(a, b):
    return ((a + b - 1) // b) * b


@functools.lru_cache(maxsize=1)
def _vmem_budget_bytes():
    """Generation-aware scoped-VMEM budget: ~3/4 of physical, capped at 100 MiB.

    v5e/v6e (128 MiB physical) -> 96 MiB; v7x (64 MiB physical) -> 48 MiB.
    """
    try:
        cap = int(pltpu.get_tpu_info().vmem_capacity_bytes)
    except Exception:  # query unavailable: assume the smallest (v7x-like) VMEM
        cap = 64 * 1024 * 1024
    return min((cap * 3) // 4, 100 * 1024 * 1024)


def _pick_tiles(m, e, x_itemsize, w_itemsize, tile_m, budget):
    """Pick (tm, tn) so double-buffered x/out tiles + the W.T block fit `budget`."""
    # Sublane packing: 8 rows for 4-byte, 16 for 2-byte, 32 for 1-byte dtypes.
    sublane = max(8, 32 // max(1, x_itemsize))
    tm = min(tile_m, _round_up(m, sublane))
    tm = max(sublane, (tm // sublane) * sublane)

    def footprint(tm_, tn_):
        split = tn_ != e
        w = 2 * e * tn_ * w_itemsize                       # W.T block (double-buffered)
        xf = 2 * tm_ * e * x_itemsize                      # x full-K tile
        xr = 2 * tm_ * tn_ * x_itemsize if split else 0    # residual x tile
        o = 2 * tm_ * tn_ * x_itemsize                     # output tile
        b = 2 * tn_ * max(w_itemsize, 4)                   # bias block
        return w + xf + xr + o + b

    # Shrink the output-feature tile first (the weight block dominates at large E);
    # tn stays a power-of-two fraction of E and a multiple of 128 (lane width).
    tn = e
    while footprint(tm, tn) > budget and tn % 2 == 0 and (tn // 2) % 128 == 0:
        tn //= 2
    # Then shrink the row tile if still over budget.
    while footprint(tm, tn) > budget and tm > sublane:
        tm = max(sublane, ((tm // 2) // sublane) * sublane)
    return tm, tn


# ---------------------------------------------------------------------------
# Public API
# ---------------------------------------------------------------------------
def prepare_mapper_params(weight, bias):
    """One-time parameter prep: hoists the E x E transpose out of the per-call path.

    `weight` is the PyTorch nn.Linear weight (E_out, E_in). Returns (W.T, bias).
    Cast the results (and x) to bfloat16 here to halve HBM traffic if numerics allow.
    """
    return jnp.asarray(weight).T, jnp.asarray(bias)


@functools.partial(jax.jit, static_argnames=("tile_m",))
def evaluator_mapper_block(x, weight_t, bias, *, tile_m=512):
    """Fused ReLU(x @ weight_t + bias) + x.  x: [..., E]; weight_t = W.T: [E, E]."""
    *lead, e = x.shape
    m = math.prod(lead) if lead else 1
    x2d = x.reshape(m, e)
    b2d = bias.reshape(1, e)

    budget = _vmem_budget_bytes()
    tm, tn = _pick_tiles(m, e, x.dtype.itemsize, weight_t.dtype.itemsize, tile_m, budget)
    m_tiles = pl.cdiv(m, tm)          # ragged last row block is masked by Pallas
    n_tiles = e // tn
    split_residual = n_tiles > 1

    # Grid: output-feature tiles outer, row tiles inner => the (E, tn) W.T block is
    # fetched once per j and stays VMEM-resident across the entire inner row loop.
    # For small E (n_tiles == 1) x and W.T are each streamed exactly once.
    in_specs = [pl.BlockSpec((tm, e), lambda j, i: (i, 0))]        # x (full K), pipelined
    inputs = [x2d]
    if split_residual:
        # Residual needs only columns [j*tn, (j+1)*tn); fetch them as their own block
        # rather than dynamically lane-slicing the full-K tile in-kernel.
        in_specs.append(pl.BlockSpec((tm, tn), lambda j, i: (i, j)))
        inputs.append(x2d)
    in_specs += [
        pl.BlockSpec((e, tn), lambda j, i: (0, j)),                # W.T block (resident per j)
        pl.BlockSpec((1, tn), lambda j, i: (0, j)),                # bias block
    ]
    inputs += [weight_t, b2d]

    out = pl.pallas_call(
        functools.partial(_mapper_kernel, split_residual=split_residual),
        out_shape=jax.ShapeDtypeStruct((m, e), x.dtype),
        grid_spec=pltpu.PrefetchScalarGridSpec(
            num_scalar_prefetch=0,
            grid=(n_tiles, m_tiles),
            in_specs=in_specs,
            out_specs=pl.BlockSpec((tm, tn), lambda j, i: (i, j)),
        ),
        compiler_params=pltpu.CompilerParams(
            # Row tiles are independent.
            # TODO(synk): on v7x use pltpu.CORE_PARALLEL (or pl.core_map) on the row
            # axis to guarantee both TensorCores are used; plain "parallel"/"arbitrary"
            # do not change codegen. If the W.T double-buffer is the VMEM bottleneck,
            # add pipeline_mode=pl.Buffered(1) to the W.T/bias specs (constant index
            # => the second buffer is wasted). The budget above already accounts for
            # 2x weight buffers, so the default configuration always fits.
            dimension_semantics=("arbitrary", "parallel"),
            vmem_limit_bytes=budget,
        ),
    )(*inputs)

    return out.reshape(x.shape)


if __name__ == "__main__":
    key = jax.random.PRNGKey(0)
    kx, kw, kb = jax.random.split(key, 3)

    B, S, E = 2, 8, 32            # small smoke-test shape (batch=2, seq=8, embed=32)
    x = jax.random.normal(kx, (B, S, E), dtype=jnp.float32)

    # nn.Linear-style init: U(-1/sqrt(E), 1/sqrt(E))
    bound = 1.0 / (E ** 0.5)
    weight = jax.random.uniform(kw, (E, E), jnp.float32, -bound, bound)
    bias = jax.random.uniform(kb, (E,), jnp.float32, -bound, bound)

    # One-time parameter prep (weight transpose hoisted out of the forward path).
    weight_t, bias_p = prepare_mapper_params(weight, bias)

    y = evaluator_mapper_block(x, weight_t, bias_p)
    jax.block_until_ready(y)

    # Reference: the PyTorch forward  ReLU(x @ W.T + b) + x  (Dropout p=0.0).
    ref = (
        jnp.maximum(
            jnp.einsum("bse,fe->bsf", x, weight, precision=jax.lax.Precision.HIGHEST)
            + bias,
            0.0,
        )
        + x
    )
    assert y.shape == x.shape
    assert jnp.allclose(y, ref, atol=1e-5, rtol=1e-5), "mismatch vs reference"

    print("KERNEL_OK")
</pallas_src>

<mosaic_0001>
module attributes {stable_mosaic.version = 11 : i64} {
  func.func @_mapper_kernel(%arg0: i32, %arg1: i32, %arg2: memref<16x32xf32, #tpu.memory_space<vmem>>, %arg3: memref<32x32xf32, #tpu.memory_space<vmem>>, %arg4: memref<1x32xf32, #tpu.memory_space<vmem>>, %arg5: memref<16x32xf32, #tpu.memory_space<vmem>>) attributes {dimension_semantics = [#tpu.dimension_semantics<arbitrary>, #tpu.dimension_semantics<parallel>], iteration_bounds = array<i64: 1, 1>, scalar_prefetch = 0 : i64, scratch_operands = 0 : i64, tpu.core_type = #tpu.core_type<tc>, window_params = [{transform_indices = @transform_0, window_bounds = array<i64: 16, 32>}, {transform_indices = @transform_1, window_bounds = array<i64: 32, 32>}, {transform_indices = @transform_2, window_bounds = array<i64: 1, 32>}, {transform_indices = @transform_3, window_bounds = array<i64: 16, 32>}]} {
    %c0 = arith.constant 0 : index
    %c0_0 = arith.constant 0 : index
    %0 = vector.load %arg2[%c0, %c0_0] : memref<16x32xf32, #tpu.memory_space<vmem>>, vector<16x32xf32>
    %c0_1 = arith.constant 0 : index
    %c0_2 = arith.constant 0 : index
    %1 = vector.load %arg3[%c0_1, %c0_2] : memref<32x32xf32, #tpu.memory_space<vmem>>, vector<32x32xf32>
    %cst = arith.constant dense<0.000000e+00> : vector<16x32xf32>
    %2 = tpu.matmul %0, %1, %cst {dimension_numbers = #tpu.dot_dimension_numbers<[1], [0], [0], [1], [0, 0, 1, 1], [], []>} : vector<16x32xf32>, vector<32x32xf32>, vector<16x32xf32> -> vector<16x32xf32>
    %c0_3 = arith.constant 0 : index
    %c0_4 = arith.constant 0 : index
    %3 = vector.load %arg4[%c0_3, %c0_4] : memref<1x32xf32, #tpu.memory_space<vmem>>, vector<1x32xf32>
    %4 = vector.broadcast %3 : vector<1x32xf32> to vector<16x32xf32>
    %5 = arith.addf %2, %4 : vector<16x32xf32>
    %cst_5 = arith.constant 0.000000e+00 : f32
    %6 = vector.broadcast %cst_5 : f32 to vector<16x32xf32>
    %7 = arith.maximumf %5, %6 : vector<16x32xf32>
    %8 = arith.addf %7, %0 : vector<16x32xf32>
    %c0_6 = arith.constant 0 : index
    %c0_7 = arith.constant 0 : index
    %9 = vector.load %arg5[%c0_6, %c0_7] : memref<16x32xf32, #tpu.memory_space<vmem>>, vector<16x32xf32>
    tpu.vector_store %arg5[%c0_6, %c0_7], %8 {strides = array<i32>} : memref<16x32xf32, #tpu.memory_space<vmem>>, vector<16x32xf32>,
    return
  }
  func.func @transform_0(%arg0: i32, %arg1: i32) -> (i32, i32) {
    %c0_i32 = arith.constant 0 : i32
    %c0_i32_0 = arith.constant 0 : i32
    return %arg1, %c0_i32 : i32, i32
  }
  func.func @transform_1(%arg0: i32, %arg1: i32) -> (i32, i32) {
    %c0_i32 = arith.constant 0 : i32
    %c0_i32_0 = arith.constant 0 : i32
    return %c0_i32, %arg0 : i32, i32
  }
  func.func @transform_2(%arg0: i32, %arg1: i32) -> (i32, i32) {
    %c0_i32 = arith.constant 0 : i32
    %c0_i32_0 = arith.constant 0 : i32
    return %c0_i32, %arg0 : i32, i32
  }
  func.func @transform_3(%arg0: i32, %arg1: i32) -> (i32, i32) {
    %c0_i32 = arith.constant 0 : i32
    return %arg1, %arg0 : i32, i32
  }
}

</mosaic_0001>

<bundles_post_ra>
// kernel: evaluator_mapper_block.1
= control target key start
LH: loop header
LB: loop body
LE: loop exit
PB: predicated region body
PF: predicated region fallthrough
CT: control target
= control target key end

     0   :  { %8 = vsyncpa [#allocation3], 0  ;;  %s344_s0 = inlined_call_operand.hbm [shape: f32[16,32], index: 0, kind: input, shape index: {}]   ;;  %s345_s1 = inlined_call_operand.hbm [shape: f32[32,32], index: 1, kind: input, shape index: {}]   ;;  %s346_s2 = inlined_call_operand.vmem [shape: f32[1,32], index: 2, kind: input, shape index: {}]   ;;  %s347_s3 = inlined_call_operand.hbm [shape: f32[16,32], index: 3, kind: output, shape index: {}]  }
   0x1   :  { %9 = vsyncpa [#allocation6], 0 }
   0x2   :  { %10 = vsyncpa [#allocation4], 0  ;;  %s267_s12 = smov [#allocation2]   ;;  %s195_s16 = scalar_lea.hbm %s344_s0, 256 }
   0x3   :  { %s16_s13 = sshll.u32 %s267_s12, 4  ;;  %p196_p0 = scmp.ne.s32.totalorder %s344_s0, %s195_s16  ;;  %s17_s13 = int_to_ptr.vmem [resolvable:$true] %s16_s13 }
   0x4   :  { %p199_p1 = scmp.lt.u32.totalorder %s195_s16, %s344_s0 }
   0x6   :  { %p201_p2 = pnand %p199_p1, %p196_p0 }
   0x8   :  { %204 = shalt.err (!%p201_p2)
}
   0x9   :  { %s205_s21 = scalar_lea.vmem %s17_s13, 256  ;;  %p210_p4 = scmp.lt.s32.totalorder %s17_s13, %s17_s13 }
   0xa   :  { %p206_p3 = scmp.ne.s32.totalorder %s17_s13, %s205_s21  ;;  %p211_p5 = scmp.lt.s32.totalorder %s205_s21, %s205_s21 }
   0xc   :  { %p212_p6 = por %p211_p5, %p210_p4 }
   0xe   :  { %p213_p7 = pnand %p212_p6, %p206_p3 }
  0x10   :  { %216 = shalt.err (!%p213_p7)
}
  0x11   :  { %s268_s22 = smov 128   ;;  %s269_s23 = smov 8  }
  0x12   :  { %22 = dma.hbm_to_vmem [thread:$0]  %s344_s0, 256, %s17_s13, [#allocation3], %s268_s22, %s268_s22, %s269_s23  }
  0x13   :  { %s270_s26 = smov [#allocation5]   ;;  %s217_s30 = scalar_lea.hbm %s345_s1, 512 }
  0x14   :  { %s28_s27 = sshll.u32 %s270_s26, 4  ;;  %p218_p8 = scmp.ne.s32.totalorder %s345_s1, %s217_s30  ;;  %s29_s27 = int_to_ptr.vmem [resolvable:$true] %s28_s27 }
  0x15   :  { %p221_p9 = scmp.lt.u32.totalorder %s217_s30, %s345_s1 }
  0x17   :  { %p223_p10 = pnand %p221_p9, %p218_p8 }
  0x19   :  { %226 = shalt.err (!%p223_p10)
}
  0x1a   :  { %s227_s8 = scalar_lea.vmem %s29_s27, 512  ;;  %p232_p12 = scmp.lt.s32.totalorder %s29_s27, %s29_s27 }
  0x1b   :  { %p228_p11 = scmp.ne.s32.totalorder %s29_s27, %s227_s8  ;;  %p233_p13 = scmp.lt.s32.totalorder %s227_s8, %s227_s8 }
  0x1d   :  { %p234_p0 = por %p233_p13, %p232_p12 }
  0x1f   :  { %p235_p1 = pnand %p234_p0, %p228_p11 }
  0x21   :  { %238 = shalt.err (!%p235_p1)
}
  0x22   :  { %34 = dma.hbm_to_vmem [thread:$0]  %s345_s1, 512, %s29_s27, [#allocation6], %s268_s22, %s268_s22, %s269_s23  }
  0x23   :  { %261 = dma.done.wait [#allocation3], 256  }
  0x24   :  { %262 = vsyncadd [#allocation3], 4294967040 }
  0x25   :  { %263 = dma.done.wait [#allocation6], 512  }
  0x26   :  { %264 = vsyncadd [#allocation6], 4294966784  ;;  %vm56_vm0 = vcmask 261120   ;;  %v45_v0 = vld [vmem:[#allocation5] sm:$0xff]  ;;  %v46_v1 = vld [vmem:[#allocation5 + $0x8] sm:$0xff]  ;;  %s271_s11 = smov [#allocation7]  }
  0x27   :  { %v47_v2 = vld [vmem:[#allocation5 + $0x10] sm:$0xff]  ;;  %v182_v3 = vpack.c.bf16 %v46_v1, %v45_v0  ;;  %v48_v4 = vld [vmem:[#allocation5 + $0x18] sm:$0xff]  ;;  %s149_s12 = sshll.u32 %s271_s11, 4  ;;  %s150_s12 = int_to_ptr.vmem [resolvable:$true] %s149_s12 }
  0x28   :  { %v43_v5 = vld [vmem:[#allocation2] sm:$0xff]  ;;  %v186_v6 = vpack.c.bf16 %v48_v4, %v47_v2  ;;  %v44_v7 = vld [vmem:[#allocation2 + $0x8] sm:$0xff]  ;;  %s239_s13 = scalar_lea.vmem %s150_s12, 256  ;;  %p244_p3 = scmp.lt.s32.totalorder %s150_s12, %s150_s12 }
  0x29   :  { %179 = vmatprep.mubr.msk.f32.mxu0 %vm56_vm0, %v43_v5  ;;  %183 = vmatprep.subr.bf16.mxu0 %v182_v3  ;;  %v162_v8 = vld [vmem:[%s346_s2] ss:$0 sm:$0xff]  ;;  %p240_p2 = scmp.ne.s32.totalorder %s150_s12, %s239_s13  ;;  %p245_p4 = scmp.lt.s32.totalorder %s239_s13, %s239_s13 }
  0x2a   :  { %185 = vmatpush3.bf16.msra.mxu0 %v182_v3 }
  0x2b   :  { %187 = vmatprep.subr.bf16.mxu0 %v186_v6  ;;  %p246_p5 = por %p245_p4, %p244_p3 }
  0x2d   :  { %p247_p6 = pnand %p246_p5, %p240_p2 }
  0x2e   :  { %189 = vmatpush3.bf16.msra.mxu0 %v186_v6 }
  0x31   :  { %180 = vmatmul.mubr.msk.f32.vlgmr.msra.gmra.mrb[0].mxu0 %vm56_vm0, %v44_v7 }
 0x104   :  { %v181_v9 = vpop.f32.mrb[0].mxu0 }
 0x105   :  { %v135_v10 = vadd.f32 %v181_v9, %v162_v8  ;;  %v129_v11 = vpop.f32.mrb[1].mxu0 }
 0x106   :  { %v130_v12 = vadd.f32 %v162_v8, %v129_v11 }
 0x107   :  { %v139_v13 = vmax.f32 %v135_v10, 0.0 }
 0x108   :  { %v138_v14 = vmax.f32 %v130_v12, 0.0 }
 0x109   :  { %v141_v15 = vadd.f32 %v139_v13, %v44_v7 }
 0x10a   :  { %v140_v16 = vadd.f32 %v138_v14, %v43_v5 }
 0x10b   :  { %143 = vst.msk [vmem:[#allocation7 + $0x8] sm:$0xff] %vm56_vm0, %v141_v15 }
 0x10c   :  { %142 = vst.msk [vmem:[#allocation7] sm:$0xff] %vm56_vm0, %v140_v16 }
 0x10d   :  { %250 = shalt.err (!%p247_p6)
}
 0x10e   :  { %s251_s15 = scalar_lea.hbm %s347_s3, 256 }
 0x10f   :  { %p252_p7 = scmp.ne.s32.totalorder %s347_s3, %s251_s15  ;;  %p255_p8 = scmp.lt.u32.totalorder %s251_s15, %s347_s3 }
 0x111   :  { %p257_p9 = pnand %p255_p8, %p252_p7 }
 0x113   :  { %260 = shalt.err (!%p257_p9)
}
 0x114   :  { %155 = dma.vmem_to_hbm [thread:$0]  %s150_s12, 256, %s347_s3, [#allocation4], %s268_s22, %s268_s22, %s269_s23  }
 0x115   :  { %265 = dma.done.wait [#allocation4], 256  }
 0x116   :  { %266 = vsyncadd [#allocation4], 4294967040 }
 0x117   :  { %159 = vsyncpa [#allocation3], 1 }
 0x118   :  { %160 = vsyncpa [#allocation6], 1 }
 0x119   :  { %161 = vsyncpa [#allocation4], 1 }

</bundles_post_ra>
